<compile_context>
chip_gen: v5e
topology: v5e:2x2
jax: 0.10.0
libtpu: 0.0.40
codegen_flags: <defaults>
</compile_context>

<pallas_src>
import functools
import math

import jax
import jax.numpy as jnp
from jax.experimental import pallas as pl
from jax.experimental.pallas import tpu as pltpu


_MAX_BATCH_UNROLL = 32  # max per-block static batch unroll inside the kernel


def make_positional_encoding(d_model: int, max_len: int = 5000) -> jnp.ndarray:
    """Deterministic buffer init, identical to the PyTorch __init__."""
    assert d_model % 2 == 0, "d_model must be even (same limitation as the PyTorch module)"
    position = jnp.arange(0, max_len, dtype=jnp.float32)[:, None]            # (max_len, 1)
    div_term = jnp.exp(
        jnp.arange(0, d_model, 2, dtype=jnp.float32) * (-math.log(10000.0) / d_model)
    )                                                                          # (d_model/2,)
    pe = jnp.zeros((max_len, d_model), dtype=jnp.float32)
    pe = pe.at[:, 0::2].set(jnp.sin(position * div_term))
    pe = pe.at[:, 1::2].set(jnp.cos(position * div_term))
    return pe  # (max_len, d_model); the PyTorch buffer is this with a size-1 middle axis


def _pe_add_kernel(x_ref, pe_ref, o_ref, *, batch_per_block: int, d_model: int):
    # x_ref : (ts, bt*D) block in VMEM (lane-dense 2D view of (ts, bt, D))
    # pe_ref: (ts, D)    block in VMEM
    pe_block = pe_ref[...]                                    # loaded once per grid step
    if batch_per_block <= _MAX_BATCH_UNROLL:
        # Per-batch static sliced adds: no (ts, bt*D) VMEM temporary, no extra
        # vector store/load pressure, lane-aligned when D % 128 == 0.
        for b in range(batch_per_block):
            col = slice(b * d_model, (b + 1) * d_model)       # static slice
            o_ref[:, col] = x_ref[:, col] + pe_block
    else:
        # Rare fallback (huge batch that could not be column-tiled cleanly):
        # keep the broadcast-add form rather than emitting a giant unroll.
        o_ref[...] = x_ref[...] + jnp.tile(pe_block, (1, batch_per_block))


def _sublane_pack(itemsize: int) -> int:
    """Packed sublane count per dtype width (f32 -> 8, bf16 -> 16, int8/fp8 -> 32)."""
    if itemsize >= 4:
        return 8
    if itemsize == 2:
        return 16
    return 32


def _vmem_budget(target_tile_bytes=None):
    """Per-generation tile target / VMEM limit (bigger tiles pay off on v7x)."""
    vmem_cap = 128 * 1024 * 1024
    try:
        info = pltpu.get_tpu_info()
        vmem_cap = int(getattr(info, "vmem_capacity_bytes", vmem_cap)) or vmem_cap
    except Exception:
        vmem_cap = 64 * 1024 * 1024          # conservative: assume v7x-sized VMEM
    if vmem_cap <= 64 * 1024 * 1024:          # v7x-class part
        tile, limit = 8 * 1024 * 1024, 48 * 1024 * 1024
    else:                                     # v5e / v6e (128 MiB physical VMEM)
        tile, limit = 8 * 1024 * 1024, 64 * 1024 * 1024
    if target_tile_bytes is not None:
        tile = int(target_tile_bytes)
    return tile, limit


def _choose_tiles(S, B, D, itemsize, target_tile_bytes):
    """Pick (row tile ts, batch-group size bt) for blocks of shape (ts, bt*D)."""
    sub = _sublane_pack(itemsize)
    lane = 128
    bt = B
    if B > _MAX_BATCH_UNROLL or sub * B * D * itemsize > target_tile_bytes:
        # Wide rows / large batch: tile the flattened column axis in batch
        # groups. bt*D must stay a multiple of 128 lanes (unmasked stores,
        # legal BlockSpec) -> bt is a multiple of 128 / gcd(D, 128).
        bt_unit = lane // math.gcd(D, lane)
        cand = (_MAX_BATCH_UNROLL // bt_unit) * bt_unit
        if 0 < cand < B:
            bt = cand
        # else keep full width; kernel falls back to the broadcast-add form.
    row_bytes = bt * D * itemsize
    ts = max(sub, (target_tile_bytes // row_bytes // sub) * sub)
    if ts >= S:
        ts = S                                # full extent along S is always legal
    return ts, bt


def positional_encoding_forward(x: jnp.ndarray, pe: jnp.ndarray,
                                *, target_tile_bytes=None,
                                donate_x: bool = False) -> jnp.ndarray:
    """x: (S, B, D), pe: (max_len, D) -> (S, B, D). Pallas path."""
    S, B, D = x.shape
    # Match PyTorch type promotion (fp32 pe promotes low-precision x to fp32).
    out_dtype = jnp.promote_types(x.dtype, pe.dtype)
    x2 = x.astype(out_dtype).reshape(S, B * D)       # contiguous, lane-dense last dim
    pe_slice = pe[:S].astype(out_dtype)              # matches self.pe[:x.size(0)]

    itemsize = jnp.dtype(out_dtype).itemsize
    tile_bytes, vmem_limit = _vmem_budget(target_tile_bytes)
    ts, bt = _choose_tiles(S, B, D, itemsize, tile_bytes)
    grid = (pl.cdiv(S, ts), pl.cdiv(B, bt))

    cost = pl.CostEstimate(
        flops=S * B * D,
        transcendentals=0,
        bytes_accessed=(2 * S * B * D + S * D) * itemsize,
    )
    aliases = {0: 0} if (donate_x and jnp.dtype(x.dtype) == jnp.dtype(out_dtype)) else {}

    out2 = pl.pallas_call(
        functools.partial(_pe_add_kernel, batch_per_block=bt, d_model=D),
        out_shape=jax.ShapeDtypeStruct((S, B * D), out_dtype),
        grid=grid,
        in_specs=[
            pl.BlockSpec((ts, bt * D), lambda i, j: (i, j)),
            pl.BlockSpec((ts, D), lambda i, j: (i, 0)),
        ],
        out_specs=pl.BlockSpec((ts, bt * D), lambda i, j: (i, j)),
        compiler_params=pltpu.CompilerParams(
            # Both axes are fully independent; "parallel" keeps portability on
            # 1-TC parts (CORE_PARALLEL on v7x is a possible further tweak).
            dimension_semantics=("parallel", "parallel"),
            vmem_limit_bytes=vmem_limit,
        ),
        cost_estimate=cost,
        input_output_aliases=aliases,
    )(x2, pe_slice)
    return out2.reshape(S, B, D)


def positional_encoding_apply(x: jnp.ndarray, pe: jnp.ndarray,
                              *, min_pallas_bytes: int = 1 << 20) -> jnp.ndarray:
    """Convenience entry: tiny inputs or B*D < 128 (lane-dense premise fails)
    use the fused XLA add; everything else goes through the Pallas kernel."""
    S, B, D = x.shape
    out_dtype = jnp.promote_types(x.dtype, pe.dtype)
    if B * D < 128 or x.size * jnp.dtype(out_dtype).itemsize < min_pallas_bytes:
        return x.astype(out_dtype) + pe[:S].astype(out_dtype)[:, None, :]
    return positional_encoding_forward(x, pe)


if __name__ == "__main__":
    # --- Small shapes consistent with the module: (seq, batch, d_model) ---
    d_model, max_len, seq_len, batch = 32, 5000, 8, 2
    pe = make_positional_encoding(d_model, max_len)
    x = jax.random.normal(jax.random.PRNGKey(0), (seq_len, batch, d_model), dtype=jnp.float32)
    out = jax.block_until_ready(positional_encoding_forward(x, pe))
    ref = x + pe[:seq_len][:, None, :]
    assert out.shape == (seq_len, batch, d_model)
    assert jnp.allclose(out, ref, atol=1e-6), "mismatch vs reference (small)"

    # --- Multi-step row-tiled path (grid > 1 along S) ---
    S2, B2, D2 = 1024, 4, 128
    pe2 = make_positional_encoding(D2, max_len=S2)
    x2 = jax.random.normal(jax.random.PRNGKey(1), (S2, B2, D2), dtype=jnp.float32)
    out2 = jax.block_until_ready(
        positional_encoding_forward(x2, pe2, target_tile_bytes=64 * 1024))
    assert jnp.allclose(out2, x2 + pe2[:S2][:, None, :], atol=1e-6), "mismatch (row-tiled)"

    # --- Wide-row path: column (batch-group) tiling, 2D grid ---
    S3, B3, D3 = 16, 64, 128
    pe3 = make_positional_encoding(D3, max_len=S3)
    x3 = jax.random.normal(jax.random.PRNGKey(2), (S3, B3, D3), dtype=jnp.float32)
    out3 = jax.block_until_ready(
        positional_encoding_forward(x3, pe3, target_tile_bytes=64 * 1024))
    assert jnp.allclose(out3, x3 + pe3[:S3][:, None, :], atol=1e-6), "mismatch (col-tiled)"

    print("KERNEL_OK")
</pallas_src>

<mosaic_0001>
module attributes {stable_mosaic.version = 11 : i64} {
  func.func @_pe_add_kernel(%arg0: i32, %arg1: i32, %arg2: memref<8x64xf32, #tpu.memory_space<vmem>>, %arg3: memref<8x32xf32, #tpu.memory_space<vmem>>, %arg4: memref<8x64xf32, #tpu.memory_space<vmem>>) attributes {dimension_semantics = [#tpu.dimension_semantics<parallel>, #tpu.dimension_semantics<parallel>], iteration_bounds = array<i64: 1, 1>, scalar_prefetch = 0 : i64, scratch_operands = 0 : i64, tpu.core_type = #tpu.core_type<tc>, window_params = [{transform_indices = @transform_0, window_bounds = array<i64: 8, 64>}, {transform_indices = @transform_1, window_bounds = array<i64: 8, 32>}, {transform_indices = @transform_2, window_bounds = array<i64: 8, 64>}]} {
    %c0 = arith.constant 0 : index
    %c0_0 = arith.constant 0 : index
    %0 = vector.load %arg3[%c0, %c0_0] : memref<8x32xf32, #tpu.memory_space<vmem>>, vector<8x32xf32>
    %c0_1 = arith.constant 0 : index
    %c0_2 = arith.constant 0 : index
    %1 = vector.load %arg2[%c0_1, %c0_2] : memref<8x64xf32, #tpu.memory_space<vmem>>, vector<8x32xf32>
    %2 = arith.addf %1, %0 : vector<8x32xf32>
    %c0_3 = arith.constant 0 : index
    %c0_4 = arith.constant 0 : index
    %3 = vector.load %arg4[%c0_3, %c0_4] : memref<8x64xf32, #tpu.memory_space<vmem>>, vector<8x32xf32>
    tpu.vector_store %arg4[%c0_3, %c0_4], %2 {strides = array<i32>} : memref<8x64xf32, #tpu.memory_space<vmem>>, vector<8x32xf32>,
    %c0_5 = arith.constant 0 : index
    %c32 = arith.constant 32 : index
    %4 = vector.load %arg2[%c0_5, %c32] : memref<8x64xf32, #tpu.memory_space<vmem>>, vector<8x32xf32>
    %5 = arith.addf %4, %0 : vector<8x32xf32>
    %c0_6 = arith.constant 0 : index
    %c32_7 = arith.constant 32 : index
    %6 = vector.load %arg4[%c0_6, %c32_7] : memref<8x64xf32, #tpu.memory_space<vmem>>, vector<8x32xf32>
    tpu.vector_store %arg4[%c0_6, %c32_7], %5 {strides = array<i32>} : memref<8x64xf32, #tpu.memory_space<vmem>>, vector<8x32xf32>,
    return
  }
  func.func @transform_0(%arg0: i32, %arg1: i32) -> (i32, i32) {
    %c0_i32 = arith.constant 0 : i32
    return %arg0, %arg1 : i32, i32
  }
  func.func @transform_1(%arg0: i32, %arg1: i32) -> (i32, i32) {
    %c0_i32 = arith.constant 0 : i32
    %c0_i32_0 = arith.constant 0 : i32
    return %arg0, %c0_i32 : i32, i32
  }
  func.func @transform_2(%arg0: i32, %arg1: i32) -> (i32, i32) {
    %c0_i32 = arith.constant 0 : i32
    return %arg0, %arg1 : i32, i32
  }
}

</mosaic_0001>

<bundles_post_ra>
// kernel: tpu_custom_call.1
= control target key start
LH: loop header
LB: loop body
LE: loop exit
PB: predicated region body
PF: predicated region fallthrough
CT: control target
= control target key end

     0   :  { %7 = vsyncpa [#allocation3], 0  ;;  %s181_s0 = inlined_call_operand.hbm [shape: f32[8,64], index: 0, kind: input, shape index: {}]   ;;  %s182_s1 = inlined_call_operand.hbm [shape: f32[8,32], index: 1, kind: input, shape index: {}]   ;;  %s183_s2 = inlined_call_operand.hbm [shape: f32[8,64], index: 2, kind: output, shape index: {}]  }
   0x1   :  { %8 = vsyncpa [#allocation6], 0 }
   0x2   :  { %9 = vsyncpa [#allocation4], 0  ;;  %s15_s11 = sshll.u32 %s181_s0, 4  ;;  %s153_s12 = smov [#allocation2]   ;;  %s16_s11 = int_to_ptr.hbm [resolvable:$true] %s15_s11 }
   0x3   :  { %s17_s13 = sshll.u32 %s153_s12, 4  ;;  %s26_s16 = sshll.u32 %s182_s1, 4  ;;  %s18_s13 = int_to_ptr.vmem [resolvable:$true] %s17_s13  ;;  %s27_s16 = int_to_ptr.hbm [resolvable:$true] %s26_s16 }
   0x4   :  { %20 = dma.hbm_to_vmem [thread:$0]  %s16_s11, 128, %s18_s13, [#allocation3]  }
   0x5   :  { %s154_s17 = smov [#allocation5]  }
   0x6   :  { %s28_s18 = sshll.u32 %s154_s17, 4  ;;  %s29_s18 = int_to_ptr.vmem [resolvable:$true] %s28_s18 }
   0x7   :  { %31 = dma.hbm_to_vmem [thread:$0]  %s27_s16, 128, %s29_s18, [#allocation6]  }
   0x8   :  { %147 = dma.done.wait [#allocation3], 128  }
   0x9   :  { %148 = vsyncadd [#allocation3], 4294967168 }
   0xa   :  { %149 = dma.done.wait [#allocation6], 128  }
   0xb   :  { %150 = vsyncadd [#allocation6], 4294967168  ;;  %v40_v0 = vld [vmem:[#allocation5] sm:$0xff]  ;;  %v41_v1 = vld [vmem:[#allocation2] sm:$0xff]  ;;  %vm43_vm0 = vcmask 261120   ;;  %s155_s0 = smov 32  }
   0xc   :  { %v42_v2 = vadd.f32 %v41_v1, %v40_v0  ;;  %47 = vrot.lane.b32.xlu0 %v40_v0, %s155_s0  ;;  %s156_s19 = smov [#allocation7]   ;;  %s60_s22 = sshll.u32 %s183_s2, 4  ;;  %vm51_vm1 = vcmask 523520   ;;  %s61_s22 = int_to_ptr.hbm [resolvable:$true] %s60_s22 }
   0xd   :  { %s58_s20 = sshll.u32 %s156_s19, 4  ;;  %s59_s20 = int_to_ptr.vmem [resolvable:$true] %s58_s20 }
   0xe   :  { %44 = vst.msk [vmem:[#allocation7] sm:$0xff] %vm43_vm0, %v42_v2 }
  0x7e   :  { %v48_v3 = vpop.permute.xlu0 %47 }
  0x7f   :  { %v50_v4 = vadd.f32 %v48_v3, %v41_v1 }
  0x81   :  { %52 = vst.msk [vmem:[#allocation7] sm:$0xff] %vm51_vm1, %v50_v4 }
  0x82   :  { %63 = dma.vmem_to_hbm [thread:$0]  %s59_s20, 128, %s61_s22, [#allocation4]  }
  0x83   :  { %151 = dma.done.wait [#allocation4], 128  }
  0x84   :  { %152 = vsyncadd [#allocation4], 4294967168 }
  0x85   :  { %68 = vsyncpa [#allocation3], 1 }
  0x86   :  { %69 = vsyncpa [#allocation6], 1 }
  0x87   :  { %70 = vsyncpa [#allocation4], 1 }

</bundles_post_ra>
